<compile_context>
chip_gen: v5e
topology: v5e:2x2
jax: 0.10.0
libtpu: 0.0.40
codegen_flags: <defaults>
</compile_context>

<pallas_src>
import functools

import jax
import jax.numpy as jnp
from jax.experimental import pallas as pl
from jax.experimental.pallas import tpu as pltpu


# --------------------------------------------------------------------------
# helpers
# --------------------------------------------------------------------------
def _round_up(x, m):
    return (x + m - 1) // m * m


def _round_down(x, m):
    return max(m, x // m * m)


def _vmem_capacity_bytes():
    try:
        return int(pltpu.get_tpu_info().vmem_capacity_bytes)
    except Exception:
        return 64 << 20  # conservative (v7x per-core); fine on v5e/v6e too


def _pick_row_tile(n_rows, bytes_per_row, *, target_bytes=4 << 20):
    """Byte-targeted row tile.  Multiple of 8 (or == full dim when tiny);
    keeps >=4 grid steps when the problem is large enough (v7x megacore)."""
    if n_rows <= 8:
        return max(1, n_rows)
    tm = _round_up(max(1, target_bytes // max(bytes_per_row, 1)), 8)
    tm = max(8, min(tm, _round_down(n_rows, 8)))
    if pl.cdiv(n_rows, tm) < 4 and n_rows >= 32:
        tm = _round_down(max(n_rows // 4, 8), 8)
    return tm


def _shrink_to_budget(tm, per_row_bytes, fixed_bytes, budget_bytes):
    while tm > 8 and fixed_bytes + tm * per_row_bytes > budget_bytes:
        tm = _round_down(max(tm // 2, 8), 8)
    return tm


# --------------------------------------------------------------------------
# shared linear (individual=False):  [M, L] @ [L, O] + b
# --------------------------------------------------------------------------
def _shared_linear_kernel(x_ref, w_ref, b_ref, o_ref, *, compute_dtype):
    # x_ref: [tm, L]  w_ref: [L, O]  b_ref: [1, O] (f32)  o_ref: [tm, O]
    xb = x_ref[...]
    if compute_dtype is not None and xb.dtype != compute_dtype:
        xb = xb.astype(compute_dtype)          # per-block cast (no HBM pass)
    y = jnp.dot(xb, w_ref[...], preferred_element_type=jnp.float32)
    y = y + b_ref[...]
    o_ref[...] = y.astype(o_ref.dtype)


def shared_linear(x2d, w, b, *, compute_dtype=None, target_block_bytes=4 << 20,
                  lane_pack=True):
    """x2d: [M, L]  w: [L, O]  b: [O] -> [M, O]."""
    M, L = x2d.shape
    O = w.shape[1]
    out_dtype = x2d.dtype

    if compute_dtype is not None:
        w = w.astype(compute_dtype)            # small + resident: one-time cast

    # Lane-dense output packing: when O < 128 and divides 128, fold G=128//O
    # logical rows into one 128-lane output row via a block-diagonal weight.
    # x/out reshapes are contiguous (free); no in-kernel reshape needed.
    G = 1
    if lane_pack and O < 128 and 128 % O == 0:
        Gc = 128 // O
        wp_bytes = (Gc * L) * (Gc * O) * jnp.dtype(w.dtype).itemsize
        if M % Gc == 0 and wp_bytes <= (4 << 20):
            G = Gc
    if G > 1:
        x2d = x2d.reshape(M // G, G * L)                    # free view
        w = jnp.kron(jnp.eye(G, dtype=w.dtype), w)          # [G*L, G*O] blockdiag
        b = jnp.tile(b, G)                                  # [G*O]
    Mg, Lg = x2d.shape
    Og = G * O

    b2 = b.reshape(1, Og).astype(jnp.float32)

    x_itm = jnp.dtype(x2d.dtype).itemsize
    o_itm = jnp.dtype(out_dtype).itemsize
    w_itm = jnp.dtype(w.dtype).itemsize

    cap = _vmem_capacity_bytes()
    tm = _pick_row_tile(Mg, Lg * x_itm, target_bytes=target_block_bytes)
    per_row = 2 * (Lg * x_itm + Og * o_itm)                 # double-buffered x/out
    fixed = 2 * (Lg * Og * w_itm + Og * 4)                  # W + bias buffers
    tm = _shrink_to_budget(tm, per_row, fixed, int(cap * 0.4))

    grid = (pl.cdiv(Mg, tm),)
    cost = pl.CostEstimate(
        flops=2 * Mg * Lg * Og,
        transcendentals=0,
        bytes_accessed=int(Mg * Lg * x_itm + Lg * Og * w_itm + Mg * Og * o_itm),
    )

    kernel = functools.partial(_shared_linear_kernel, compute_dtype=compute_dtype)
    out = pl.pallas_call(
        kernel,
        out_shape=jax.ShapeDtypeStruct((Mg, Og), out_dtype),
        grid=grid,
        in_specs=[
            pl.BlockSpec((tm, Lg), lambda i: (i, 0)),    # x rows
            pl.BlockSpec((Lg, Og), lambda i: (0, 0)),    # W (resident)
            pl.BlockSpec((1, Og), lambda i: (0, 0)),     # b (resident)
        ],
        out_specs=pl.BlockSpec((tm, Og), lambda i: (i, 0)),
        compiler_params=pltpu.CompilerParams(
            dimension_semantics=("parallel",),
            vmem_limit_bytes=int(cap * 0.75),
        ),
        cost_estimate=cost,
    )(x2d, w, b2)

    if G > 1:
        out = out.reshape(M, O)                             # free view back
    return out


# --------------------------------------------------------------------------
# per-channel linear (individual=True):  out[:, c, :] = x[:, c, :] @ W[c] + b[c]
# --------------------------------------------------------------------------
def _individual_linear_kernel(x_ref, w_ref, b_ref, o_ref, *, tc, compute_dtype):
    # x_ref: [tb, tc, L]  w_ref: [tc, L, O]  b_ref: [tc, O] (f32)  o_ref: [tb, tc, O]
    for j in range(tc):                         # trace-time unroll over channel chunk
        xj = x_ref[:, j, :]
        if compute_dtype is not None and xj.dtype != compute_dtype:
            xj = xj.astype(compute_dtype)
        y = jnp.dot(xj, w_ref[j], preferred_element_type=jnp.float32)
        y = y + b_ref[j]
        o_ref[:, j, :] = y.astype(o_ref.dtype)


def individual_linear(x, w, b, *, compute_dtype=None, target_block_bytes=4 << 20):
    """x: [B, C, L]  w: [C, L, O]  b: [C, O] -> [B, C, O].  No transposes."""
    B, C, L = x.shape
    O = w.shape[-1]
    out_dtype = x.dtype

    if compute_dtype is not None:
        w = w.astype(compute_dtype)             # one-time cast (small, resident)

    # Channel chunk: full C when small (block dim == full dim is always legal);
    # otherwise a multiple of 8 so the second-minor block dim satisfies layout.
    tc = C if C <= 16 else 8

    x_itm = jnp.dtype(x.dtype).itemsize
    o_itm = jnp.dtype(out_dtype).itemsize
    w_itm = jnp.dtype(w.dtype).itemsize

    cap = _vmem_capacity_bytes()
    tb = _pick_row_tile(B, tc * L * x_itm, target_bytes=target_block_bytes)
    per_row = 2 * tc * (L * x_itm + O * o_itm)
    fixed = 2 * tc * (L * O * w_itm + O * 4)
    tb = _shrink_to_budget(tb, per_row, fixed, int(cap * 0.4))

    b2 = b.astype(jnp.float32)                  # [C, O]

    grid = (pl.cdiv(C, tc), pl.cdiv(B, tb))     # channel axis outer -> W resident
    cost = pl.CostEstimate(
        flops=2 * B * C * L * O,
        transcendentals=0,
        bytes_accessed=int(B * C * L * x_itm + C * L * O * w_itm + B * C * O * o_itm),
    )

    kernel = functools.partial(_individual_linear_kernel, tc=tc,
                               compute_dtype=compute_dtype)
    out = pl.pallas_call(
        kernel,
        out_shape=jax.ShapeDtypeStruct((B, C, O), out_dtype),
        grid=grid,
        in_specs=[
            pl.BlockSpec((tb, tc, L), lambda c, i: (i, c, 0)),  # x rows, chan chunk
            pl.BlockSpec((tc, L, O), lambda c, i: (c, 0, 0)),   # W chunk (resident over i)
            pl.BlockSpec((tc, O), lambda c, i: (c, 0)),         # b chunk
        ],
        out_specs=pl.BlockSpec((tb, tc, O), lambda c, i: (i, c, 0)),
        compiler_params=pltpu.CompilerParams(
            dimension_semantics=("parallel", "parallel"),
            vmem_limit_bytes=int(cap * 0.75),
        ),
        cost_estimate=cost,
    )(x, w, b2)
    return out


# --------------------------------------------------------------------------
# module-level forward
# --------------------------------------------------------------------------
def block_model_forward(x, params, *, individual, compute_dtype=None,
                        force_pallas=False, min_flops_for_pallas=1 << 21):
    """block_model.forward.  (self.ln / self.relu are unused in the reference
    forward, so they are intentionally not applied here.)"""
    w, b = params
    B, C, L = x.shape
    O = w.shape[-1]

    # Tiny problems: pallas_call launch/grid overhead dominates -> let XLA fuse.
    if (not force_pallas) and 2 * B * C * L * O < min_flops_for_pallas:
        return _reference(x, params, individual)

    if individual:
        return individual_linear(x, w, b, compute_dtype=compute_dtype)
    out2d = shared_linear(x.reshape(B * C, L), w, b, compute_dtype=compute_dtype)
    return out2d.reshape(B, C, O)


# --------------------------------------------------------------------------
# parameter init (mirrors nn.Linear default init; weights stored as [in, out])
# --------------------------------------------------------------------------
def init_shared_params(key, input_len, out_len, dtype=jnp.float32):
    k1, k2 = jax.random.split(key)
    s = 1.0 / jnp.sqrt(jnp.float32(input_len))
    w = jax.random.uniform(k1, (input_len, out_len), dtype, -s, s)
    b = jax.random.uniform(k2, (out_len,), dtype, -s, s)
    return (w, b)


def init_individual_params(key, channels, input_len, out_len, dtype=jnp.float32):
    k1, k2 = jax.random.split(key)
    s = 1.0 / jnp.sqrt(jnp.float32(input_len))
    w = jax.random.uniform(k1, (channels, input_len, out_len), dtype, -s, s)
    b = jax.random.uniform(k2, (channels, out_len), dtype, -s, s)
    return (w, b)


# --------------------------------------------------------------------------
# pure-JAX reference
# --------------------------------------------------------------------------
def _reference(x, params, individual):
    w, b = params
    if individual:
        return jnp.einsum("bcl,clo->bco", x, w) + b[None, :, :]
    return x @ w + b


if __name__ == "__main__":
    key = jax.random.PRNGKey(0)
    k1, k2, k3, k4, k5, k6, k7 = jax.random.split(key, 7)

    # --- 1) shared path, lane-packed output (O=32 < 128, M % G == 0) -------
    B, C, L, O = 2, 4, 16, 32
    x = jax.random.normal(k1, (B, C, L), jnp.float32)
    p_shared = init_shared_params(k2, L, O)
    out_s = jax.block_until_ready(
        block_model_forward(x, p_shared, individual=False, force_pallas=True))
    ref_s = _reference(x, p_shared, False)
    assert out_s.shape == (B, C, O)
    assert jnp.allclose(out_s, ref_s, atol=1e-4, rtol=1e-4), "shared (packed) mismatch"

    # --- 2) shared path, ragged rows, no lane packing (partial edge block) -
    B2, C2, L2, O2 = 5, 7, 16, 24
    x2 = jax.random.normal(k3, (B2, C2, L2), jnp.float32)
    p2 = init_shared_params(k4, L2, O2)
    out2 = jax.block_until_ready(
        block_model_forward(x2, p2, individual=False, force_pallas=True))
    assert out2.shape == (B2, C2, O2)
    assert jnp.allclose(out2, _reference(x2, p2, False), atol=1e-4, rtol=1e-4), \
        "shared (ragged) mismatch"

    # --- 3) individual path, full-channel block -----------------------------
    p_ind = init_individual_params(k5, C, L, O)
    out_i = jax.block_until_ready(
        block_model_forward(x, p_ind, individual=True, force_pallas=True))
    assert out_i.shape == (B, C, O)
    assert jnp.allclose(out_i, _reference(x, p_ind, True), atol=1e-4, rtol=1e-4), \
        "individual mismatch"

    # --- 4) individual path, ragged batch (partial leading block) ----------
    B4, C4, L4, O4 = 11, 5, 16, 24
    x4 = jax.random.normal(k6, (B4, C4, L4), jnp.float32)
    p4 = init_individual_params(k7, C4, L4, O4)
    out4 = jax.block_until_ready(
        block_model_forward(x4, p4, individual=True, force_pallas=True))
    assert out4.shape == (B4, C4, O4)
    assert jnp.allclose(out4, _reference(x4, p4, True), atol=1e-4, rtol=1e-4), \
        "individual (ragged) mismatch"

    # --- 5) bf16 MXU path: W cast once in wrapper, x cast per-block in-kernel
    out_bf = jax.block_until_ready(
        block_model_forward(x, p_shared, individual=False,
                            compute_dtype=jnp.bfloat16, force_pallas=True))
    assert jnp.allclose(out_bf, ref_s, atol=5e-2, rtol=5e-2), "bf16 mismatch"

    print("KERNEL_OK")
</pallas_src>

<mosaic_0001>
module attributes {stable_mosaic.version = 11 : i64} {
  func.func @_shared_linear_kernel(%arg0: i32, %arg1: memref<2x64xf32, #tpu.memory_space<vmem>>, %arg2: memref<64x128xf32, #tpu.memory_space<vmem>>, %arg3: memref<1x128xf32, #tpu.memory_space<vmem>>, %arg4: memref<2x128xf32, #tpu.memory_space<vmem>>) attributes {dimension_semantics = [#tpu.dimension_semantics<parallel>], iteration_bounds = array<i64: 1>, scalar_prefetch = 0 : i64, scratch_operands = 0 : i64, tpu.core_type = #tpu.core_type<tc>, window_params = [{transform_indices = @transform_0, window_bounds = array<i64: 2, 64>}, {pipeline_mode = #tpu.pipeline_mode<synchronous>, transform_indices = @transform_1, window_bounds = array<i64: 64, 128>}, {pipeline_mode = #tpu.pipeline_mode<synchronous>, transform_indices = @transform_2, window_bounds = array<i64: 1, 128>}, {transform_indices = @transform_3, window_bounds = array<i64: 2, 128>}]} {
    %c0 = arith.constant 0 : index
    %c0_0 = arith.constant 0 : index
    %0 = vector.load %arg1[%c0, %c0_0] : memref<2x64xf32, #tpu.memory_space<vmem>>, vector<2x64xf32>
    %c0_1 = arith.constant 0 : index
    %c0_2 = arith.constant 0 : index
    %1 = vector.load %arg2[%c0_1, %c0_2] : memref<64x128xf32, #tpu.memory_space<vmem>>, vector<64x128xf32>
    %cst = arith.constant dense<0.000000e+00> : vector<2x128xf32>
    %2 = tpu.matmul %0, %1, %cst {dimension_numbers = #tpu.dot_dimension_numbers<[1], [0], [0], [1], [0, 0, 1, 1], [], []>} : vector<2x64xf32>, vector<64x128xf32>, vector<2x128xf32> -> vector<2x128xf32>
    %c0_3 = arith.constant 0 : index
    %c0_4 = arith.constant 0 : index
    %3 = vector.load %arg3[%c0_3, %c0_4] : memref<1x128xf32, #tpu.memory_space<vmem>>, vector<1x128xf32>
    %4 = vector.broadcast %3 : vector<1x128xf32> to vector<2x128xf32>
    %5 = arith.addf %2, %4 : vector<2x128xf32>
    %c0_5 = arith.constant 0 : index
    %c0_6 = arith.constant 0 : index
    %6 = vector.load %arg4[%c0_5, %c0_6] : memref<2x128xf32, #tpu.memory_space<vmem>>, vector<2x128xf32>
    tpu.vector_store %arg4[%c0_5, %c0_6], %5 {strides = array<i32>} : memref<2x128xf32, #tpu.memory_space<vmem>>, vector<2x128xf32>,
    return
  }
  func.func @transform_0(%arg0: i32) -> (i32, i32) {
    %c0_i32 = arith.constant 0 : i32
    %c0_i32_0 = arith.constant 0 : i32
    return %arg0, %c0_i32 : i32, i32
  }
  func.func @transform_1(%arg0: i32) -> (i32, i32) {
    %c0_i32 = arith.constant 0 : i32
    %c0_i32_0 = arith.constant 0 : i32
    %c0_i32_1 = arith.constant 0 : i32
    return %c0_i32, %c0_i32_0 : i32, i32
  }
  func.func @transform_2(%arg0: i32) -> (i32, i32) {
    %c0_i32 = arith.constant 0 : i32
    %c0_i32_0 = arith.constant 0 : i32
    %c0_i32_1 = arith.constant 0 : i32
    return %c0_i32, %c0_i32_0 : i32, i32
  }
  func.func @transform_3(%arg0: i32) -> (i32, i32) {
    %c0_i32 = arith.constant 0 : i32
    %c0_i32_0 = arith.constant 0 : i32
    return %arg0, %c0_i32 : i32, i32
  }
}

</mosaic_0001>

<bundles_post_ra>
// kernel: tpu_custom_call.1
= control target key start
LH: loop header
LB: loop body
LE: loop exit
PB: predicated region body
PF: predicated region fallthrough
CT: control target
= control target key end

     0   :  { %8 = vsyncpa [#allocation3], 0  ;;  %s223_s0 = inlined_call_operand.hbm [shape: f32[2,64], index: 0, kind: input, shape index: {}]   ;;  %s224_s1 = inlined_call_operand.hbm [shape: f32[64,128], index: 1, kind: input, shape index: {}]   ;;  %s225_s2 = inlined_call_operand.vmem [shape: f32[1,128], index: 2, kind: input, shape index: {}]   ;;  %s226_s3 = inlined_call_operand.hbm [shape: f32[2,128], index: 3, kind: output, shape index: {}]  }
   0x1   :  { %9 = vsyncpa [#allocation6], 0 }
   0x2   :  { %10 = vsyncpa [#allocation4], 0  ;;  %s16_s14 = sshll.u32 %s223_s0, 4  ;;  %s186_s15 = smov [#allocation2]   ;;  %s17_s14 = int_to_ptr.hbm [resolvable:$true] %s16_s14 }
   0x3   :  { %s18_s16 = sshll.u32 %s186_s15, 4  ;;  %s26_s19 = sshll.u32 %s224_s1, 4  ;;  %s19_s16 = int_to_ptr.vmem [resolvable:$true] %s18_s16  ;;  %s27_s19 = int_to_ptr.hbm [resolvable:$true] %s26_s19 }
   0x4   :  { %21 = dma.hbm_to_vmem [thread:$0]  %s17_s14, 32, %s19_s16, [#allocation3]  }
   0x5   :  { %s187_s20 = smov [#allocation5]   ;;  %s188_s22 = smov 128  }
   0x6   :  { %s28_s21 = sshll.u32 %s187_s20, 4  ;;  %s189_s23 = smov 8   ;;  %s29_s21 = int_to_ptr.vmem [resolvable:$true] %s28_s21 }
   0x7   :  { %34 = dma.hbm_to_vmem [thread:$0]  %s27_s19, 1024, %s29_s21, [#allocation6], %s188_s22, %s188_s22, %s189_s23  }
   0x8   :  { %180 = dma.done.wait [#allocation3], 32  }
   0x9   :  { %181 = vsyncadd [#allocation3], 4294967264 }
   0xa   :  { %182 = dma.done.wait [#allocation6], 1024  }
   0xb   :  { %183 = vsyncadd [#allocation6], 4294966272  ;;  %v53_v0 = vld [vmem:[#allocation5 + $0x38] sm:$0xff]  ;;  %v52_v1 = vld [vmem:[#allocation5 + $0x30] sm:$0xff]  ;;  %vm58_vm0 = vcmask 523264   ;;  %s190_s24 = smov [#allocation7]  }
   0xc   :  { %70 = vmatpush.msra.mxu0 %v53_v0  ;;  %v51_v2 = vld [vmem:[#allocation5 + $0x28] sm:$0xff]  ;;  %v50_v3 = vld [vmem:[#allocation5 + $0x20] sm:$0xff]  ;;  %v49_v4 = vld [vmem:[#allocation5 + $0x18] sm:$0xff]  ;;  %s88_s25 = sshll.u32 %s190_s24, 4  ;;  %s90_s28 = sshll.u32 %s226_s3, 4  ;;  %s89_s25 = int_to_ptr.vmem [resolvable:$true] %s88_s25  ;;  %s91_s28 = int_to_ptr.hbm [resolvable:$true] %s90_s28 }
   0xd   :  { %v48_v5 = vld [vmem:[#allocation5 + $0x10] sm:$0xff]  ;;  %v47_v6 = vld [vmem:[#allocation5 + $0x8] sm:$0xff]  ;;  %v46_v7 = vld [vmem:[#allocation5] sm:$0xff] }
   0xe   :  { %71 = vmatpush.msra.mxu0 %v52_v1  ;;  %v45_v8 = vld [vmem:[#allocation2] sm:$0x3] }
   0xf   :  { %v107_v9 = vld [vmem:[%s225_s2] ss:$0 sm:$0xff] }
  0x10   :  { %72 = vmatpush.msra.mxu0 %v51_v2 }
  0x12   :  { %73 = vmatpush.msra.mxu0 %v50_v3 }
  0x14   :  { %74 = vmatpush.msra.mxu0 %v49_v4 }
  0x16   :  { %75 = vmatpush.msra.mxu0 %v48_v5 }
  0x18   :  { %76 = vmatpush.msra.mxu0 %v47_v6 }
  0x1a   :  { %77 = vmatpush.msra.mxu0 %v46_v7 }
  0x1b   :  { %101 = vmatmul.msk.f32.vlgmr.msra.gmra.mxu0 %vm58_vm0, %v45_v8 }
  0x98   :  { %v79_v10 = vpop.f32.mrf.mxu0 }
  0x99   :  { %v80_v11 = vadd.f32 %v107_v9, %v79_v10 }
  0x9b   :  { %82 = vst [vmem:[#allocation7] sm:$0x3] %v80_v11 }
  0x9c   :  { %93 = dma.vmem_to_hbm [thread:$0]  %s89_s25, 32, %s91_s28, [#allocation4]  }
  0x9d   :  { %184 = dma.done.wait [#allocation4], 32  }
  0x9e   :  { %185 = vsyncadd [#allocation4], 4294967264 }
  0x9f   :  { %98 = vsyncpa [#allocation3], 1 }
  0xa0   :  { %99 = vsyncpa [#allocation6], 1 }
  0xa1   :  { %100 = vsyncpa [#allocation4], 1 }

</bundles_post_ra>
